<compile_context>
chip_gen: v7x
topology: tpu7x:2x2x1
jax: 0.10.0
libtpu: 0.0.40
codegen_flags: <defaults>
</compile_context>

<pallas_src>
import jax
import jax.numpy as jnp
from jax import lax
from jax.experimental import pallas as pl
from jax.experimental.pallas import tpu as pltpu

_LANE = 128


def _lstm_tagger_kernel(embeds_ref, w_ih_t_ref, w_hh_t_ref, bias_ref,
                        w_tag_t_ref, b_tag_ref, out_ref):
    T = embeds_ref.shape[0]
    H = w_hh_t_ref.shape[0]

    # Hoisted input projection: one batched MXU matmul, bias folded in.
    x_proj = (jnp.dot(embeds_ref[...], w_ih_t_ref[...],
                      preferred_element_type=jnp.float32)
              + bias_ref[...])                                  # (T, 4H)

    w_hh_t = w_hh_t_ref[...]                                    # (H, 4H), resident

    # Fully unrolled recurrence; h/c and per-step outputs stay in vregs.
    h = jnp.zeros((1, H), jnp.float32)
    c = jnp.zeros((1, H), jnp.float32)
    hs = []
    for t in range(T):                                          # T static -> unrolled
        gates = x_proj[t:t + 1, :] + jnp.dot(
            h, w_hh_t, preferred_element_type=jnp.float32)      # (1, 4H)
        # Two EUP pushes per step: full-width sigmoid + tanh on the g slice.
        sig = jax.nn.sigmoid(gates)
        i_g = sig[:, 0:H]
        f_g = sig[:, H:2 * H]
        o_g = sig[:, 3 * H:4 * H]
        g_g = jnp.tanh(gates[:, 2 * H:3 * H])
        c = f_g * c + i_g * g_g
        h = o_g * jnp.tanh(c)
        hs.append(h)

    lstm_out = jnp.concatenate(hs, axis=0)                      # (T, H), in registers

    # Output projection into a lane-dense padded tag dimension.
    tag_space = (jnp.dot(lstm_out, w_tag_t_ref[...],
                         preferred_element_type=jnp.float32)
                 + b_tag_ref[...])                              # (T, TAGS_PAD)

    # log_softmax over dim=1; padded lanes carry -1e30 bias -> exp() == 0.
    m = jnp.max(tag_space, axis=1, keepdims=True)
    shifted = tag_space - m
    lse = jnp.log(jnp.sum(jnp.exp(shifted), axis=1, keepdims=True))
    out_ref[...] = shifted - lse


@jax.jit
def lstm_tagger_forward(sentence, params):
    # Embedding lookup (gather) — plain JAX glue.
    embeds = jnp.take(params["embedding"], sentence, axis=0).astype(jnp.float32)  # (T, E)
    T, E = embeds.shape
    H = params["w_hh"].shape[1]
    tagset_size = params["b_tag"].shape[-1]
    tags_pad = max(_LANE, ((tagset_size + _LANE - 1) // _LANE) * _LANE)

    w_ih_t = params["w_ih"].T.astype(jnp.float32)               # (E, 4H)
    w_hh_t = params["w_hh"].T.astype(jnp.float32)               # (H, 4H)
    bias = (params["b_ih"] + params["b_hh"]).reshape(1, -1).astype(jnp.float32)

    # Lane-dense tag projection: zero-pad weight columns; padded bias lanes get
    # a large finite negative so they vanish under log_softmax (no inf-inf NaN).
    w_tag_t = jnp.zeros((H, tags_pad), jnp.float32).at[:, :tagset_size].set(
        params["w_tag"].T.astype(jnp.float32))
    b_tag = jnp.full((1, tags_pad), -1e30, jnp.float32).at[0, :tagset_size].set(
        params["b_tag"].astype(jnp.float32))

    four_h = 4 * H
    cost = pl.CostEstimate(
        flops=2 * T * (E + H) * four_h + 2 * T * H * tags_pad,
        transcendentals=T * (four_h + 2 * H) + T * tags_pad,
        bytes_accessed=4 * (embeds.size + w_ih_t.size + w_hh_t.size + bias.size
                            + w_tag_t.size + b_tag.size + T * tags_pad),
    )

    vmem = pl.BlockSpec(memory_space=pltpu.MemorySpace.VMEM)
    out_padded = pl.pallas_call(
        _lstm_tagger_kernel,
        out_shape=jax.ShapeDtypeStruct((T, tags_pad), jnp.float32),
        in_specs=[vmem] * 6,
        out_specs=vmem,
        cost_estimate=cost,
    )(embeds, w_ih_t, w_hh_t, bias, w_tag_t, b_tag)

    # TODO(synk): for long sequences / batched sentences, tile T with a grid
    # axis and carry (h, c) in VMEM scratch instead of whole-array residency.
    return out_padded[:, :tagset_size]


def _reference_forward(sentence, params):
    """Pure-JAX reference matching torch.nn.LSTM / Linear / log_softmax semantics."""
    embeds = jnp.take(params["embedding"], sentence, axis=0)
    H = params["w_hh"].shape[1]

    def step(carry, x_t):
        h, c = carry
        gates = (x_t @ params["w_ih"].T + params["b_ih"]
                 + h @ params["w_hh"].T + params["b_hh"])
        i = jax.nn.sigmoid(gates[0:H])
        f = jax.nn.sigmoid(gates[H:2 * H])
        g = jnp.tanh(gates[2 * H:3 * H])
        o = jax.nn.sigmoid(gates[3 * H:4 * H])
        c_new = f * c + i * g
        h_new = o * jnp.tanh(c_new)
        return (h_new, c_new), h_new

    h0 = jnp.zeros((H,), jnp.float32)
    _, lstm_out = lax.scan(step, (h0, h0), embeds)
    tag_space = lstm_out @ params["w_tag"].T + params["b_tag"]
    return jax.nn.log_softmax(tag_space, axis=1)


if __name__ == "__main__":
    # Small shapes consistent with the module's forward.
    EMBEDDING_DIM = 32
    HIDDEN_DIM = 32
    VOCAB_SIZE = 10
    TAGSET_SIZE = 4
    SEQ_LEN = 8

    key = jax.random.PRNGKey(0)
    ks = jax.random.split(key, 8)
    scale = 1.0 / jnp.sqrt(HIDDEN_DIM)
    params = {
        "embedding": jax.random.normal(ks[0], (VOCAB_SIZE, EMBEDDING_DIM), jnp.float32),
        "w_ih": jax.random.uniform(ks[1], (4 * HIDDEN_DIM, EMBEDDING_DIM),
                                   jnp.float32, -scale, scale),
        "w_hh": jax.random.uniform(ks[2], (4 * HIDDEN_DIM, HIDDEN_DIM),
                                   jnp.float32, -scale, scale),
        "b_ih": jax.random.uniform(ks[3], (4 * HIDDEN_DIM,), jnp.float32, -scale, scale),
        "b_hh": jax.random.uniform(ks[4], (4 * HIDDEN_DIM,), jnp.float32, -scale, scale),
        "w_tag": jax.random.uniform(ks[5], (TAGSET_SIZE, HIDDEN_DIM),
                                    jnp.float32, -scale, scale),
        "b_tag": jax.random.uniform(ks[6], (TAGSET_SIZE,), jnp.float32, -scale, scale),
    }

    sentence = jax.random.randint(ks[7], (SEQ_LEN,), 0, VOCAB_SIZE, dtype=jnp.int32)

    out = lstm_tagger_forward(sentence, params)
    out = jax.block_until_ready(out)

    ref = _reference_forward(sentence, params)
    assert out.shape == (SEQ_LEN, TAGSET_SIZE)
    assert jnp.allclose(out, ref, atol=1e-5, rtol=1e-5)

    print("KERNEL_OK")
</pallas_src>

<mosaic_0001>
module attributes {stable_mosaic.version = 11 : i64} {
  func.func @_lstm_tagger_kernel(%arg0: memref<8x32xf32, #tpu.memory_space<vmem>>, %arg1: memref<32x128xf32, #tpu.memory_space<vmem>>, %arg2: memref<32x128xf32, #tpu.memory_space<vmem>>, %arg3: memref<1x128xf32, #tpu.memory_space<vmem>>, %arg4: memref<32x128xf32, #tpu.memory_space<vmem>>, %arg5: memref<1x128xf32, #tpu.memory_space<vmem>>, %arg6: memref<8x128xf32, #tpu.memory_space<vmem>>) attributes {dimension_semantics = [], scalar_prefetch = 0 : i64, scratch_operands = 0 : i64, tpu.core_type = #tpu.core_type<tc>} {
    %c0 = arith.constant 0 : index
    %c0_0 = arith.constant 0 : index
    %0 = vector.load %arg0[%c0, %c0_0] : memref<8x32xf32, #tpu.memory_space<vmem>>, vector<8x32xf32>
    %c0_1 = arith.constant 0 : index
    %c0_2 = arith.constant 0 : index
    %1 = vector.load %arg1[%c0_1, %c0_2] : memref<32x128xf32, #tpu.memory_space<vmem>>, vector<32x128xf32>
    %cst = arith.constant dense<0.000000e+00> : vector<8x128xf32>
    %2 = tpu.matmul %0, %1, %cst {dimension_numbers = #tpu.dot_dimension_numbers<[1], [0], [0], [1], [0, 0, 1, 1], [], []>} : vector<8x32xf32>, vector<32x128xf32>, vector<8x128xf32> -> vector<8x128xf32>
    %c0_3 = arith.constant 0 : index
    %c0_4 = arith.constant 0 : index
    %3 = vector.load %arg3[%c0_3, %c0_4] : memref<1x128xf32, #tpu.memory_space<vmem>>, vector<1x128xf32>
    %4 = vector.broadcast %3 : vector<1x128xf32> to vector<8x128xf32>
    %5 = arith.addf %2, %4 : vector<8x128xf32>
    %c0_5 = arith.constant 0 : index
    %c0_6 = arith.constant 0 : index
    %6 = vector.load %arg2[%c0_5, %c0_6] : memref<32x128xf32, #tpu.memory_space<vmem>>, vector<32x128xf32>
    %cst_7 = arith.constant 0.000000e+00 : f32
    %7 = vector.broadcast %cst_7 : f32 to vector<1x32xf32>
    %cst_8 = arith.constant 0.000000e+00 : f32
    %8 = vector.broadcast %cst_8 : f32 to vector<1x32xf32>
    %9 = vector.extract_strided_slice %5 {offsets = [0, 0], sizes = [1, 128], strides = [1, 1]} : vector<8x128xf32> to vector<1x128xf32>
    %cst_9 = arith.constant dense<0.000000e+00> : vector<1x128xf32>
    %10 = tpu.matmul %7, %6, %cst_9 {dimension_numbers = #tpu.dot_dimension_numbers<[1], [0], [0], [1], [0, 0, 1, 1], [], []>} : vector<1x32xf32>, vector<32x128xf32>, vector<1x128xf32> -> vector<1x128xf32>
    %11 = arith.addf %9, %10 : vector<1x128xf32>
    %12 = arith.negf %11 : vector<1x128xf32>
    %13 = math.exp %12 : vector<1x128xf32>
    %cst_10 = arith.constant 1.000000e+00 : f32
    %14 = vector.broadcast %cst_10 : f32 to vector<1x128xf32>
    %15 = arith.addf %14, %13 : vector<1x128xf32>
    %16 = arith.divf %14, %15 : vector<1x128xf32>
    %17 = vector.extract_strided_slice %16 {offsets = [0, 0], sizes = [1, 32], strides = [1, 1]} : vector<1x128xf32> to vector<1x32xf32>
    %18 = vector.extract_strided_slice %16 {offsets = [0, 32], sizes = [1, 32], strides = [1, 1]} : vector<1x128xf32> to vector<1x32xf32>
    %19 = vector.extract_strided_slice %16 {offsets = [0, 96], sizes = [1, 32], strides = [1, 1]} : vector<1x128xf32> to vector<1x32xf32>
    %20 = vector.extract_strided_slice %11 {offsets = [0, 64], sizes = [1, 32], strides = [1, 1]} : vector<1x128xf32> to vector<1x32xf32>
    %21 = math.tanh %20 : vector<1x32xf32>
    %22 = arith.mulf %18, %8 : vector<1x32xf32>
    %23 = arith.mulf %17, %21 : vector<1x32xf32>
    %24 = arith.addf %22, %23 : vector<1x32xf32>
    %25 = math.tanh %24 : vector<1x32xf32>
    %26 = arith.mulf %19, %25 : vector<1x32xf32>
    %27 = vector.extract_strided_slice %5 {offsets = [1, 0], sizes = [1, 128], strides = [1, 1]} : vector<8x128xf32> to vector<1x128xf32>
    %cst_11 = arith.constant dense<0.000000e+00> : vector<1x128xf32>
    %28 = tpu.matmul %26, %6, %cst_11 {dimension_numbers = #tpu.dot_dimension_numbers<[1], [0], [0], [1], [0, 0, 1, 1], [], []>} : vector<1x32xf32>, vector<32x128xf32>, vector<1x128xf32> -> vector<1x128xf32>
    %29 = arith.addf %27, %28 : vector<1x128xf32>
    %30 = arith.negf %29 : vector<1x128xf32>
    %31 = math.exp %30 : vector<1x128xf32>
    %cst_12 = arith.constant 1.000000e+00 : f32
    %32 = vector.broadcast %cst_12 : f32 to vector<1x128xf32>
    %33 = arith.addf %32, %31 : vector<1x128xf32>
    %34 = arith.divf %32, %33 : vector<1x128xf32>
    %35 = vector.extract_strided_slice %34 {offsets = [0, 0], sizes = [1, 32], strides = [1, 1]} : vector<1x128xf32> to vector<1x32xf32>
    %36 = vector.extract_strided_slice %34 {offsets = [0, 32], sizes = [1, 32], strides = [1, 1]} : vector<1x128xf32> to vector<1x32xf32>
    %37 = vector.extract_strided_slice %34 {offsets = [0, 96], sizes = [1, 32], strides = [1, 1]} : vector<1x128xf32> to vector<1x32xf32>
    %38 = vector.extract_strided_slice %29 {offsets = [0, 64], sizes = [1, 32], strides = [1, 1]} : vector<1x128xf32> to vector<1x32xf32>
    %39 = math.tanh %38 : vector<1x32xf32>
    %40 = arith.mulf %36, %24 : vector<1x32xf32>
    %41 = arith.mulf %35, %39 : vector<1x32xf32>
    %42 = arith.addf %40, %41 : vector<1x32xf32>
    %43 = math.tanh %42 : vector<1x32xf32>
    %44 = arith.mulf %37, %43 : vector<1x32xf32>
    %45 = vector.extract_strided_slice %5 {offsets = [2, 0], sizes = [1, 128], strides = [1, 1]} : vector<8x128xf32> to vector<1x128xf32>
    %cst_13 = arith.constant dense<0.000000e+00> : vector<1x128xf32>
    %46 = tpu.matmul %44, %6, %cst_13 {dimension_numbers = #tpu.dot_dimension_numbers<[1], [0], [0], [1], [0, 0, 1, 1], [], []>} : vector<1x32xf32>, vector<32x128xf32>, vector<1x128xf32> -> vector<1x128xf32>
    %47 = arith.addf %45, %46 : vector<1x128xf32>
    %48 = arith.negf %47 : vector<1x128xf32>
    %49 = math.exp %48 : vector<1x128xf32>
    %cst_14 = arith.constant 1.000000e+00 : f32
    %50 = vector.broadcast %cst_14 : f32 to vector<1x128xf32>
    %51 = arith.addf %50, %49 : vector<1x128xf32>
    %52 = arith.divf %50, %51 : vector<1x128xf32>
    %53 = vector.extract_strided_slice %52 {offsets = [0, 0], sizes = [1, 32], strides = [1, 1]} : vector<1x128xf32> to vector<1x32xf32>
    %54 = vector.extract_strided_slice %52 {offsets = [0, 32], sizes = [1, 32], strides = [1, 1]} : vector<1x128xf32> to vector<1x32xf32>
    %55 = vector.extract_strided_slice %52 {offsets = [0, 96], sizes = [1, 32], strides = [1, 1]} : vector<1x128xf32> to vector<1x32xf32>
    %56 = vector.extract_strided_slice %47 {offsets = [0, 64], sizes = [1, 32], strides = [1, 1]} : vector<1x128xf32> to vector<1x32xf32>
    %57 = math.tanh %56 : vector<1x32xf32>
    %58 = arith.mulf %54, %42 : vector<1x32xf32>
    %59 = arith.mulf %53, %57 : vector<1x32xf32>
    %60 = arith.addf %58, %59 : vector<1x32xf32>
    %61 = math.tanh %60 : vector<1x32xf32>
    %62 = arith.mulf %55, %61 : vector<1x32xf32>
    %63 = vector.extract_strided_slice %5 {offsets = [3, 0], sizes = [1, 128], strides = [1, 1]} : vector<8x128xf32> to vector<1x128xf32>
    %cst_15 = arith.constant dense<0.000000e+00> : vector<1x128xf32>
    %64 = tpu.matmul %62, %6, %cst_15 {dimension_numbers = #tpu.dot_dimension_numbers<[1], [0], [0], [1], [0, 0, 1, 1], [], []>} : vector<1x32xf32>, vector<32x128xf32>, vector<1x128xf32> -> vector<1x128xf32>
    %65 = arith.addf %63, %64 : vector<1x128xf32>
    %66 = arith.negf %65 : vector<1x128xf32>
    %67 = math.exp %66 : vector<1x128xf32>
    %cst_16 = arith.constant 1.000000e+00 : f32
    %68 = vector.broadcast %cst_16 : f32 to vector<1x128xf32>
    %69 = arith.addf %68, %67 : vector<1x128xf32>
    %70 = arith.divf %68, %69 : vector<1x128xf32>
    %71 = vector.extract_strided_slice %70 {offsets = [0, 0], sizes = [1, 32], strides = [1, 1]} : vector<1x128xf32> to vector<1x32xf32>
    %72 = vector.extract_strided_slice %70 {offsets = [0, 32], sizes = [1, 32], strides = [1, 1]} : vector<1x128xf32> to vector<1x32xf32>
    %73 = vector.extract_strided_slice %70 {offsets = [0, 96], sizes = [1, 32], strides = [1, 1]} : vector<1x128xf32> to vector<1x32xf32>
    %74 = vector.extract_strided_slice %65 {offsets = [0, 64], sizes = [1, 32], strides = [1, 1]} : vector<1x128xf32> to vector<1x32xf32>
    %75 = math.tanh %74 : vector<1x32xf32>
    %76 = arith.mulf %72, %60 : vector<1x32xf32>
    %77 = arith.mulf %71, %75 : vector<1x32xf32>
    %78 = arith.addf %76, %77 : vector<1x32xf32>
    %79 = math.tanh %78 : vector<1x32xf32>
    %80 = arith.mulf %73, %79 : vector<1x32xf32>
    %81 = vector.extract_strided_slice %5 {offsets = [4, 0], sizes = [1, 128], strides = [1, 1]} : vector<8x128xf32> to vector<1x128xf32>
    %cst_17 = arith.constant dense<0.000000e+00> : vector<1x128xf32>
    %82 = tpu.matmul %80, %6, %cst_17 {dimension_numbers = #tpu.dot_dimension_numbers<[1], [0], [0], [1], [0, 0, 1, 1], [], []>} : vector<1x32xf32>, vector<32x128xf32>, vector<1x128xf32> -> vector<1x128xf32>
    %83 = arith.addf %81, %82 : vector<1x128xf32>
    %84 = arith.negf %83 : vector<1x128xf32>
    %85 = math.exp %84 : vector<1x128xf32>
    %cst_18 = arith.constant 1.000000e+00 : f32
    %86 = vector.broadcast %cst_18 : f32 to vector<1x128xf32>
    %87 = arith.addf %86, %85 : vector<1x128xf32>
    %88 = arith.divf %86, %87 : vector<1x128xf32>
    %89 = vector.extract_strided_slice %88 {offsets = [0, 0], sizes = [1, 32], strides = [1, 1]} : vector<1x128xf32> to vector<1x32xf32>
    %90 = vector.extract_strided_slice %88 {offsets = [0, 32], sizes = [1, 32], strides = [1, 1]} : vector<1x128xf32> to vector<1x32xf32>
    %91 = vector.extract_strided_slice %88 {offsets = [0, 96], sizes = [1, 32], strides = [1, 1]} : vector<1x128xf32> to vector<1x32xf32>
    %92 = vector.extract_strided_slice %83 {offsets = [0, 64], sizes = [1, 32], strides = [1, 1]} : vector<1x128xf32> to vector<1x32xf32>
    %93 = math.tanh %92 : vector<1x32xf32>
    %94 = arith.mulf %90, %78 : vector<1x32xf32>
    %95 = arith.mulf %89, %93 : vector<1x32xf32>
    %96 = arith.addf %94, %95 : vector<1x32xf32>
    %97 = math.tanh %96 : vector<1x32xf32>
    %98 = arith.mulf %91, %97 : vector<1x32xf32>
    %99 = vector.extract_strided_slice %5 {offsets = [5, 0], sizes = [1, 128], strides = [1, 1]} : vector<8x128xf32> to vector<1x128xf32>
    %cst_19 = arith.constant dense<0.000000e+00> : vector<1x128xf32>
    %100 = tpu.matmul %98, %6, %cst_19 {dimension_numbers = #tpu.dot_dimension_numbers<[1], [0], [0], [1], [0, 0, 1, 1], [], []>} : vector<1x32xf32>, vector<32x128xf32>, vector<1x128xf32> -> vector<1x128xf32>
    %101 = arith.addf %99, %100 : vector<1x128xf32>
    %102 = arith.negf %101 : vector<1x128xf32>
    %103 = math.exp %102 : vector<1x128xf32>
    %cst_20 = arith.constant 1.000000e+00 : f32
    %104 = vector.broadcast %cst_20 : f32 to vector<1x128xf32>
    %105 = arith.addf %104, %103 : vector<1x128xf32>
    %106 = arith.divf %104, %105 : vector<1x128xf32>
    %107 = vector.extract_strided_slice %106 {offsets = [0, 0], sizes = [1, 32], strides = [1, 1]} : vector<1x128xf32> to vector<1x32xf32>
    %108 = vector.extract_strided_slice %106 {offsets = [0, 32], sizes = [1, 32], strides = [1, 1]} : vector<1x128xf32> to vector<1x32xf32>
    %109 = vector.extract_strided_slice %106 {offsets = [0, 96], sizes = [1, 32], strides = [1, 1]} : vector<1x128xf32> to vector<1x32xf32>
    %110 = vector.extract_strided_slice %101 {offsets = [0, 64], sizes = [1, 32], strides = [1, 1]} : vector<1x128xf32> to vector<1x32xf32>
    %111 = math.tanh %110 : vector<1x32xf32>
    %112 = arith.mulf %108, %96 : vector<1x32xf32>
    %113 = arith.mulf %107, %111 : vector<1x32xf32>
    %114 = arith.addf %112, %113 : vector<1x32xf32>
    %115 = math.tanh %114 : vector<1x32xf32>
    %116 = arith.mulf %109, %115 : vector<1x32xf32>
    %117 = vector.extract_strided_slice %5 {offsets = [6, 0], sizes = [1, 128], strides = [1, 1]} : vector<8x128xf32> to vector<1x128xf32>
    %cst_21 = arith.constant dense<0.000000e+00> : vector<1x128xf32>
    %118 = tpu.matmul %116, %6, %cst_21 {dimension_numbers = #tpu.dot_dimension_numbers<[1], [0], [0], [1], [0, 0, 1, 1], [], []>} : vector<1x32xf32>, vector<32x128xf32>, vector<1x128xf32> -> vector<1x128xf32>
    %119 = arith.addf %117, %118 : vector<1x128xf32>
    %120 = arith.negf %119 : vector<1x128xf32>
    %121 = math.exp %120 : vector<1x128xf32>
    %cst_22 = arith.constant 1.000000e+00 : f32
    %122 = vector.broadcast %cst_22 : f32 to vector<1x128xf32>
    %123 = arith.addf %122, %121 : vector<1x128xf32>
    %124 = arith.divf %122, %123 : vector<1x128xf32>
    %125 = vector.extract_strided_slice %124 {offsets = [0, 0], sizes = [1, 32], strides = [1, 1]} : vector<1x128xf32> to vector<1x32xf32>
    %126 = vector.extract_strided_slice %124 {offsets = [0, 32], sizes = [1, 32], strides = [1, 1]} : vector<1x128xf32> to vector<1x32xf32>
    %127 = vector.extract_strided_slice %124 {offsets = [0, 96], sizes = [1, 32], strides = [1, 1]} : vector<1x128xf32> to vector<1x32xf32>
    %128 = vector.extract_strided_slice %119 {offsets = [0, 64], sizes = [1, 32], strides = [1, 1]} : vector<1x128xf32> to vector<1x32xf32>
    %129 = math.tanh %128 : vector<1x32xf32>
    %130 = arith.mulf %126, %114 : vector<1x32xf32>
    %131 = arith.mulf %125, %129 : vector<1x32xf32>
    %132 = arith.addf %130, %131 : vector<1x32xf32>
    %133 = math.tanh %132 : vector<1x32xf32>
    %134 = arith.mulf %127, %133 : vector<1x32xf32>
    %135 = vector.extract_strided_slice %5 {offsets = [7, 0], sizes = [1, 128], strides = [1, 1]} : vector<8x128xf32> to vector<1x128xf32>
    %cst_23 = arith.constant dense<0.000000e+00> : vector<1x128xf32>
    %136 = tpu.matmul %134, %6, %cst_23 {dimension_numbers = #tpu.dot_dimension_numbers<[1], [0], [0], [1], [0, 0, 1, 1], [], []>} : vector<1x32xf32>, vector<32x128xf32>, vector<1x128xf32> -> vector<1x128xf32>
    %137 = arith.addf %135, %136 : vector<1x128xf32>
    %138 = arith.negf %137 : vector<1x128xf32>
    %139 = math.exp %138 : vector<1x128xf32>
    %cst_24 = arith.constant 1.000000e+00 : f32
    %140 = vector.broadcast %cst_24 : f32 to vector<1x128xf32>
    %141 = arith.addf %140, %139 : vector<1x128xf32>
    %142 = arith.divf %140, %141 : vector<1x128xf32>
    %143 = vector.extract_strided_slice %142 {offsets = [0, 0], sizes = [1, 32], strides = [1, 1]} : vector<1x128xf32> to vector<1x32xf32>
    %144 = vector.extract_strided_slice %142 {offsets = [0, 32], sizes = [1, 32], strides = [1, 1]} : vector<1x128xf32> to vector<1x32xf32>
    %145 = vector.extract_strided_slice %142 {offsets = [0, 96], sizes = [1, 32], strides = [1, 1]} : vector<1x128xf32> to vector<1x32xf32>
    %146 = vector.extract_strided_slice %137 {offsets = [0, 64], sizes = [1, 32], strides = [1, 1]} : vector<1x128xf32> to vector<1x32xf32>
    %147 = math.tanh %146 : vector<1x32xf32>
    %148 = arith.mulf %144, %132 : vector<1x32xf32>
    %149 = arith.mulf %143, %147 : vector<1x32xf32>
    %150 = arith.addf %148, %149 : vector<1x32xf32>
    %151 = math.tanh %150 : vector<1x32xf32>
    %152 = arith.mulf %145, %151 : vector<1x32xf32>
    %153 = tpu.concatenate %26, %44, %62, %80, %98, %116, %134, %152 in 0 : vector<1x32xf32>, vector<1x32xf32>, vector<1x32xf32>, vector<1x32xf32>, vector<1x32xf32>, vector<1x32xf32>, vector<1x32xf32>, vector<1x32xf32> -> vector<8x32xf32>
    %c0_25 = arith.constant 0 : index
    %c0_26 = arith.constant 0 : index
    %154 = vector.load %arg4[%c0_25, %c0_26] : memref<32x128xf32, #tpu.memory_space<vmem>>, vector<32x128xf32>
    %cst_27 = arith.constant dense<0.000000e+00> : vector<8x128xf32>
    %155 = tpu.matmul %153, %154, %cst_27 {dimension_numbers = #tpu.dot_dimension_numbers<[1], [0], [0], [1], [0, 0, 1, 1], [], []>} : vector<8x32xf32>, vector<32x128xf32>, vector<8x128xf32> -> vector<8x128xf32>
    %c0_28 = arith.constant 0 : index
    %c0_29 = arith.constant 0 : index
    %156 = vector.load %arg5[%c0_28, %c0_29] : memref<1x128xf32, #tpu.memory_space<vmem>>, vector<1x128xf32>
    %157 = vector.broadcast %156 : vector<1x128xf32> to vector<8x128xf32>
    %158 = arith.addf %155, %157 : vector<8x128xf32>
    %cst_30 = arith.constant dense<0xFF800000> : vector<8xf32>
    %159 = vector.multi_reduction <maximumf>, %158, %cst_30 [1] : vector<8x128xf32> to vector<8xf32>
    %160 = vector.shape_cast %159 : vector<8xf32> to vector<8x1xf32>
    %161 = vector.broadcast %160 : vector<8x1xf32> to vector<8x128xf32>
    %162 = arith.subf %158, %161 : vector<8x128xf32>
    %163 = math.exp %162 : vector<8x128xf32>
    %cst_31 = arith.constant dense<0.000000e+00> : vector<8xf32>
    %164 = vector.multi_reduction <add>, %163, %cst_31 [1] : vector<8x128xf32> to vector<8xf32>
    %165 = vector.shape_cast %164 : vector<8xf32> to vector<8x1xf32>
    %166 = math.log %165 : vector<8x1xf32>
    %167 = vector.broadcast %166 : vector<8x1xf32> to vector<8x128xf32>
    %168 = arith.subf %162, %167 : vector<8x128xf32>
    %c0_32 = arith.constant 0 : index
    %c0_33 = arith.constant 0 : index
    %169 = vector.load %arg6[%c0_32, %c0_33] : memref<8x128xf32, #tpu.memory_space<vmem>>, vector<8x128xf32>
    tpu.vector_store %arg6[%c0_32, %c0_33], %168 {strides = array<i32>} : memref<8x128xf32, #tpu.memory_space<vmem>>, vector<8x128xf32>,
    return
  }
}

</mosaic_0001>

<bundles_post_ra>
// kernel: lstm_tagger_forward.1
= control target key start
LH: loop header
LB: loop body
LE: loop exit
PB: predicated region body
PF: predicated region fallthrough
CT: control target
= control target key end

     0   :  { %v1386_v0 = vmov 0.0|0.0   ;;  %vm1387_vm0 = vmmov 0   ;;  %v1388_v8 = vmov 0.0   ;;  %vm35_vm1 = vcmask 261120   ;;  %s1389_s14 = smov 64   ;;  %s1590_s1 = inlined_call_operand.vmem [shape: f32[32,128], index: 1, kind: input, shape index: {}]   ;;  %s1591_s2 = inlined_call_operand.vmem [shape: f32[32,128], index: 2, kind: input, shape index: {}]   ;;  %s1592_s0 = inlined_call_operand.vmem [shape: f32[8,32], index: 0, kind: input, shape index: {}]   ;;  %s1593_s3 = inlined_call_operand.vmem [shape: f32[1,128], index: 3, kind: input, shape index: {}]   ;;  %s1594_s4 = inlined_call_operand.vmem [shape: f32[32,128], index: 4, kind: input, shape index: {}]   ;;  %s1595_s5 = inlined_call_operand.vmem [shape: f32[1,128], index: 5, kind: input, shape index: {}]   ;;  %s1596_s6 = inlined_call_operand.vmem [shape: f32[8,128], index: 6, kind: output, shape index: {}]  }
   0x1   :  { %1253 = vmatprep.subr.bf16.mxu0 %v1386_v0  ;;  %v24_v1 = vld [vmem:[%s1590_s1] sm:$0xff]  ;;  %v25_v2 = vld [vmem:[%s1590_s1 + $0x8] sm:$0xff]  ;;  %1259 = vmatprep.subr.bf16.mxu1 %v1386_v0  ;;  %v26_v6 = vld [vmem:[%s1590_s1 + $0x10] sm:$0xff]  ;;  %vm959_vm2 = vcmask 1040384   ;;  %vm961_vm3 = vcmask 1041408   ;;  %vm963_vm4 = vcmask 1042432  }
   0x2   :  { %v109_v3 = vld [vmem:[%s1591_s2] sm:$0xff]  ;;  %v1254_v4 = vpack.c.bf16 %v25_v2, %v24_v1  ;;  %v110_v5 = vld [vmem:[%s1591_s2 + $0x8] sm:$0xff]  ;;  %v27_v7 = vld [vmem:[%s1590_s1 + $0x18] sm:$0xff]  ;;  %1151 = vmatprep.mubr.msk.f32.mxu0 %vm1387_vm0, %v1388_v8  ;;  %1162 = vmatprep.mubr.msk.f32.mxu1 %vm1387_vm0, %v1388_v8  ;;  %vm965_vm5 = vcmask 1043456   ;;  %vm967_vm6 = vcmask 1044480   ;;  %vm969_vm7 = vcmask 1045504  }
   0x3   :  { %v1450_v9 = vpack.c.bf16 %v110_v5, %v109_v3  ;;  %v111_v10 = vld [vmem:[%s1591_s2 + $0x10] sm:$0xff]  ;;  %v112_v11 = vld [vmem:[%s1591_s2 + $0x18] sm:$0xff]  ;;  %v1257_v12 = vpack.c.bf16 %v27_v7, %v26_v6  ;;  %v23_v14 = vld [vmem:[%s1592_s0] sm:$0xff]  ;;  %vm971_vm8 = vcmask 1046528  }
   0x4   :  { %1255 = vmatpush3.bf16.msra.mxu0 %v1254_v4  ;;  %v1460_v13 = vpack.c.bf16 %v112_v11, %v111_v10  ;;  %v1074_v15 = vld [vmem:[%s1593_s3] ss:$0 sm:$0xff]  ;;  %s1390_s3 = smov 32  }
   0x5   :  { %1261 = vmatpush3.bf16.msra.mxu1 %v1450_v9  ;;  %1256 = vmatprep.subr.bf16.mxu0 %v1386_v0 }
   0x6   :  { %1262 = vmatprep.subr.bf16.mxu1 %v1386_v0 }
   0x8   :  { %1258 = vmatpush3.bf16.msra.mxu0 %v1257_v12 }
   0x9   :  { %1264 = vmatpush3.bf16.msra.mxu1 %v1460_v13  ;;  %1265 = vmatprep.subr.bf16.mxu0 %v1386_v0 }
   0xa   :  { %1271 = vmatprep.subr.bf16.mxu1 %v1386_v0 }
   0xb   :  { %1152 = vmatmul.mubr.msk.f32.vlgmr.msra.gmra.mrb[0].mxu0 %vm35_vm1, %v23_v14 }
   0xc   :  { %1163 = vmatmul.mubr.f32.vlgmr.msra.gmra.mrb[0].mxu1 %v1388_v8  ;;  %1267 = vmatpush3.bf16.msra.mxu0 %v1450_v9 }
   0xd   :  { %1268 = vmatprep.subr.bf16.mxu0 %v1386_v0  ;;  %1173 = vmatprep.mubr.msk.f32.mxu0 %vm1387_vm0, %v1388_v8 }
   0xe   :  { %1273 = vmatpush3.bf16.msra.mxu1 %v1450_v9  ;;  %1184 = vmatprep.mubr.msk.f32.mxu1 %vm1387_vm0, %v1388_v8 }
   0xf   :  { %1274 = vmatprep.subr.bf16.mxu1 %v1386_v0 }
  0x10   :  { %1270 = vmatpush3.bf16.msra.mxu0 %v1460_v13 }
  0x11   :  { %1277 = vmatprep.subr.bf16.mxu0 %v1386_v0 }
  0x12   :  { %1276 = vmatpush3.bf16.msra.mxu1 %v1460_v13 }
  0x13   :  { %1283 = vmatprep.subr.bf16.mxu1 %v1386_v0 }
  0xde   :  { %v105_v16 = vpop.f32.mrb[0].mxu0 }
  0xdf   :  { %v1486_v17 = vadd.f32 %v1074_v15, %v105_v16  ;;  %v1153_v18 = vpop.f32.mrb[1].mxu0  ;;  %v182_v19 = vpop.f32.mrb[0].mxu1 }
  0xe0   :  { %v1164_v20 = vpop.f32.mrb[1].mxu1 }
  0xe1   :  { %v186_v21 = vadd.f32 %v182_v19, %v1486_v17 }
  0xe3   :  { %1318 = vtanh.f32 %v186_v21  ;;  %v1076_v23 = vmul.f32 -1.442695, %v186_v21 }
  0xe5   :  { %1320 = vpow2.f32 %v1076_v23 }
  0xed   :  { %v1319_v22 = vpop.eup %1318 }
  0xee   :  { %196 = vrot.lane.b32.xlu0 %v1319_v22, %s1389_s14 }
  0xef   :  { %v1321_v24 = vpop.eup %1320 }
  0xf0   :  { %v190_v25 = vadd.f32 1.0, %v1321_v24 }
  0xf2   :  { %1322 = vrcp.f32 %v190_v25 }
  0xfc   :  { %v1323_v26 = vpop.eup %1322 }
  0xfd   :  { %v194_v29 = vmul.f32 0.0, %v1323_v26 }
 0x160   :  { %v197_v27 = vpop.permute.xlu0 %196 }
 0x161   :  { %v199_v28 = vmul.f32 %v1323_v26, %v197_v27 }
 0x163   :  { %201 = vrot.lane.b32.xlu0 %v199_v28, %s1390_s3 }
 0x1d5   :  { %v202_v30 = vpop.permute.xlu0 %201 }
 0x1d6   :  { %v204_v31 = vadd.f32 %v202_v30, %v194_v29 }
 0x1d8   :  { %1324 = vtanh.f32 %v204_v31  ;;  %v298_v47 = vrot.slane %v204_v31, 7 }
 0x1e2   :  { %v1325_v32 = vpop.eup %1324 }
 0x1e3   :  { %207 = vrot.lane.b32.xlu1 %v1325_v32, %s1389_s14 }
 0x255   :  { %v208_v33 = vpop.permute.xlu1 %207 }
 0x256   :  { %v1492_v34 = vmul.f32 %v1323_v26, %v208_v33 }
 0x258   :  { %212 = vrot.lane.b32.xlu1 %v1492_v34, %s1390_s3 }
 0x2ca   :  { %v213_v35 = vpop.permute.xlu1 %212 }
 0x2cb   :  { %1174 = vmatmul.mubr.msk.f32.vlgmr.msra.gmra.mrb[2].mxu0 %vm35_vm1, %v213_v35 }
 0x2cc   :  { %1279 = vmatpush3.bf16.msra.mxu0 %v1450_v9  ;;  %1195 = vmatprep.mubr.msk.f32.mxu0 %vm1387_vm0, %v1388_v8 }
 0x2cd   :  { %1280 = vmatprep.subr.bf16.mxu0 %v1386_v0 }
 0x2d0   :  { %1282 = vmatpush3.bf16.msra.mxu0 %v1460_v13 }
 0x2d1   :  { %1289 = vmatprep.subr.bf16.mxu0 %v1386_v0 }
 0x39e   :  { %v282_v36 = vpop.f32.mrb[2].mxu0 }
 0x39f   :  { %v287_v37 = vrot.slane %v282_v36, 7  ;;  %v1175_v38 = vpop.f32.mrb[3].mxu0 }
 0x3a1   :  { %v289_v39 = vadd.f32 %v287_v37, %v1486_v17 }
 0x3a3   :  { %1326 = vtanh.f32 %v289_v39  ;;  %v1078_v41 = vmul.f32 -1.442695, %v289_v39 }
 0x3a5   :  { %1328 = vpow2.f32 %v1078_v41 }
 0x3ad   :  { %v1327_v40 = vpop.eup %1326 }
 0x3ae   :  { %302 = vrot.lane.b32.xlu0 %v1327_v40, %s1389_s14 }
 0x3af   :  { %v1329_v42 = vpop.eup %1328 }
 0x3b0   :  { %v293_v43 = vadd.f32 1.0, %v1329_v42 }
 0x3b2   :  { %1330 = vrcp.f32 %v293_v43 }
 0x3bc   :  { %v1331_v44 = vpop.eup %1330 }
 0x3bd   :  { %v300_v48 = vmul.f32 %v1331_v44, %v298_v47 }
 0x420   :  { %v303_v45 = vpop.permute.xlu0 %302 }
 0x421   :  { %v305_v46 = vmul.f32 %v1331_v44, %v303_v45 }
 0x423   :  { %307 = vrot.lane.b32.xlu1 %v305_v46, %s1390_s3 }
 0x495   :  { %v308_v49 = vpop.permute.xlu1 %307 }
 0x496   :  { %v310_v50 = vadd.f32 %v308_v49, %v300_v48 }
 0x498   :  { %1332 = vtanh.f32 %v310_v50  ;;  %v405_v4 = vrot.slane %v310_v50, 7 }
 0x4a2   :  { %v1333_v51 = vpop.eup %1332 }
 0x4a3   :  { %313 = vrot.lane.b32.xlu0 %v1333_v51, %s1389_s14 }
 0x515   :  { %v314_v52 = vpop.permute.xlu0 %313 }
 0x516   :  { %v316_v53 = vmul.f32 %v1331_v44, %v314_v52 }
 0x518   :  { %v318_v54 = vrot.slane %v316_v53, 1  ;;  %v960_v14 = vsel %vm959_vm2, %v1492_v34, %v316_v53 }
 0x51a   :  { %319 = vrot.lane.b32.xlu1 %v318_v54, %s1390_s3 }
 0x58c   :  { %v320_v55 = vpop.permute.xlu1 %319 }
 0x58d   :  { %1185 = vmatmul.mubr.msk.f32.vlgmr.msra.gmra.mrb[2].mxu1 %vm35_vm1, %v320_v55 }
 0x58e   :  { %1285 = vmatpush3.bf16.msra.mxu1 %v1450_v9  ;;  %1206 = vmatprep.mubr.msk.f32.mxu1 %vm1387_vm0, %v1388_v8 }
 0x58f   :  { %1286 = vmatprep.subr.bf16.mxu1 %v1386_v0 }
 0x592   :  { %1288 = vmatpush3.bf16.msra.mxu1 %v1460_v13 }
 0x593   :  { %1295 = vmatprep.subr.bf16.mxu1 %v1386_v0 }
 0x660   :  { %v389_v56 = vpop.f32.mrb[2].mxu1 }
 0x661   :  { %v394_v57 = vrot.slane %v389_v56, 6  ;;  %v1186_v58 = vpop.f32.mrb[3].mxu1 }
 0x663   :  { %v396_v59 = vadd.f32 %v394_v57, %v1486_v17 }
 0x665   :  { %1334 = vtanh.f32 %v396_v59  ;;  %v1080_v61 = vmul.f32 -1.442695, %v396_v59 }
 0x667   :  { %1336 = vpow2.f32 %v1080_v61 }
 0x66f   :  { %v1335_v60 = vpop.eup %1334 }
 0x670   :  { %409 = vrot.lane.b32.xlu0 %v1335_v60, %s1389_s14 }
 0x671   :  { %v1337_v62 = vpop.eup %1336 }
 0x672   :  { %v400_v63 = vadd.f32 1.0, %v1337_v62 }
 0x674   :  { %1338 = vrcp.f32 %v400_v63 }
 0x67e   :  { %v1339_v1 = vpop.eup %1338 }
 0x67f   :  { %v407_v5 = vmul.f32 %v1339_v1, %v405_v4 }
 0x6e2   :  { %v410_v2 = vpop.permute.xlu0 %409 }
 0x6e3   :  { %v412_v3 = vmul.f32 %v1339_v1, %v410_v2 }
 0x6e5   :  { %414 = vrot.lane.b32.xlu1 %v412_v3, %s1390_s3 }
 0x757   :  { %v415_v6 = vpop.permute.xlu1 %414 }
 0x758   :  { %v417_v7 = vadd.f32 %v415_v6, %v407_v5 }
 0x75a   :  { %1340 = vtanh.f32 %v417_v7  ;;  %v512_v30 = vrot.slane %v417_v7, 7 }
 0x764   :  { %v1341_v10 = vpop.eup %1340 }
 0x765   :  { %420 = vrot.lane.b32.xlu0 %v1341_v10, %s1389_s14 }
 0x7d7   :  { %v421_v11 = vpop.permute.xlu0 %420 }
 0x7d8   :  { %v423_v12 = vmul.f32 %v1339_v1, %v421_v11 }
 0x7da   :  { %v425_v15 = vrot.slane %v423_v12, 2  ;;  %v962_v16 = vsel %vm961_vm3, %v960_v14, %v423_v12 }
 0x7dc   :  { %426 = vrot.lane.b32.xlu1 %v425_v15, %s1390_s3 }
 0x84e   :  { %v427_v18 = vpop.permute.xlu1 %426 }
 0x84f   :  { %1196 = vmatmul.mubr.msk.f32.vlgmr.msra.gmra.mrb[4].mxu0 %vm35_vm1, %v427_v18 }
 0x850   :  { %1291 = vmatpush3.bf16.msra.mxu0 %v1450_v9  ;;  %1217 = vmatprep.mubr.msk.f32.mxu0 %vm1387_vm0, %v1388_v8 }
 0x851   :  { %1292 = vmatprep.subr.bf16.mxu0 %v1386_v0 }
 0x854   :  { %1294 = vmatpush3.bf16.msra.mxu0 %v1460_v13 }
 0x855   :  { %1301 = vmatprep.subr.bf16.mxu0 %v1386_v0 }
 0x922   :  { %v496_v19 = vpop.f32.mrb[4].mxu0 }
 0x923   :  { %v501_v20 = vrot.slane %v496_v19, 5  ;;  %v1197_v21 = vpop.f32.mrb[5].mxu0 }
 0x925   :  { %v503_v22 = vadd.f32 %v501_v20, %v1486_v17 }
 0x927   :  { %1342 = vtanh.f32 %v503_v22  ;;  %v1082_v24 = vmul.f32 -1.442695, %v503_v22 }
 0x929   :  { %1344 = vpow2.f32 %v1082_v24 }
 0x931   :  { %v1343_v23 = vpop.eup %1342 }
 0x932   :  { %516 = vrot.lane.b32.xlu0 %v1343_v23, %s1389_s14 }
 0x933   :  { %v1345_v25 = vpop.eup %1344 }
 0x934   :  { %v507_v26 = vadd.f32 1.0, %v1345_v25 }
 0x936   :  { %1346 = vrcp.f32 %v507_v26 }
 0x940   :  { %v1347_v27 = vpop.eup %1346 }
 0x941   :  { %v514_v31 = vmul.f32 %v1347_v27, %v512_v30 }
 0x9a4   :  { %v517_v28 = vpop.permute.xlu0 %516 }
 0x9a5   :  { %v519_v29 = vmul.f32 %v1347_v27, %v517_v28 }
 0x9a7   :  { %521 = vrot.lane.b32.xlu1 %v519_v29, %s1390_s3 }
 0xa19   :  { %v522_v32 = vpop.permute.xlu1 %521 }
 0xa1a   :  { %v524_v33 = vadd.f32 %v522_v32, %v514_v31 }
 0xa1c   :  { %1348 = vtanh.f32 %v524_v33  ;;  %v619_v51 = vrot.slane %v524_v33, 7 }
 0xa26   :  { %v1349_v34 = vpop.eup %1348 }
 0xa27   :  { %527 = vrot.lane.b32.xlu0 %v1349_v34, %s1389_s14 }
 0xa99   :  { %v528_v35 = vpop.permute.xlu0 %527 }
 0xa9a   :  { %v530_v36 = vmul.f32 %v1347_v27, %v528_v35 }
 0xa9c   :  { %v532_v37 = vrot.slane %v530_v36, 3  ;;  %v964_v38 = vsel %vm963_vm4, %v962_v16, %v530_v36 }
 0xa9e   :  { %533 = vrot.lane.b32.xlu1 %v532_v37, %s1390_s3 }
 0xb10   :  { %v534_v39 = vpop.permute.xlu1 %533 }
 0xb11   :  { %1207 = vmatmul.mubr.msk.f32.vlgmr.msra.gmra.mrb[4].mxu1 %vm35_vm1, %v534_v39 }
 0xb12   :  { %1297 = vmatpush3.bf16.msra.mxu1 %v1450_v9  ;;  %1228 = vmatprep.mubr.msk.f32.mxu1 %vm1387_vm0, %v1388_v8 }
 0xb13   :  { %1298 = vmatprep.subr.bf16.mxu1 %v1386_v0 }
 0xb16   :  { %1300 = vmatpush3.bf16.msra.mxu1 %v1460_v13 }
 0xb17   :  { %1307 = vmatprep.subr.bf16.mxu1 %v1386_v0 }
 0xbe4   :  { %v603_v40 = vpop.f32.mrb[4].mxu1 }
 0xbe5   :  { %v608_v41 = vrot.slane %v603_v40, 4  ;;  %v1208_v42 = vpop.f32.mrb[5].mxu1 }
 0xbe7   :  { %v610_v43 = vadd.f32 %v608_v41, %v1486_v17 }
 0xbe9   :  { %1350 = vtanh.f32 %v610_v43  ;;  %v1084_v45 = vmul.f32 -1.442695, %v610_v43 }
 0xbeb   :  { %1352 = vpow2.f32 %v1084_v45 }
 0xbf3   :  { %v1351_v44 = vpop.eup %1350 }
 0xbf4   :  { %623 = vrot.lane.b32.xlu0 %v1351_v44, %s1389_s14 }
 0xbf5   :  { %v1353_v46 = vpop.eup %1352 }
 0xbf6   :  { %v614_v47 = vadd.f32 1.0, %v1353_v46 }
 0xbf8   :  { %1354 = vrcp.f32 %v614_v47 }
 0xc02   :  { %v1355_v48 = vpop.eup %1354 }
 0xc03   :  { %v621_v52 = vmul.f32 %v1355_v48, %v619_v51 }
 0xc66   :  { %v624_v49 = vpop.permute.xlu0 %623 }
 0xc67   :  { %v626_v50 = vmul.f32 %v1355_v48, %v624_v49 }
 0xc69   :  { %628 = vrot.lane.b32.xlu1 %v626_v50, %s1390_s3 }
 0xcdb   :  { %v629_v53 = vpop.permute.xlu1 %628 }
 0xcdc   :  { %v631_v54 = vadd.f32 %v629_v53, %v621_v52 }
 0xcde   :  { %1356 = vtanh.f32 %v631_v54 }
 0xce8   :  { %v1357_v55 = vpop.eup %1356 }
 0xce9   :  { %634 = vrot.lane.b32.xlu0 %v1357_v55, %s1389_s14 }
 0xd5b   :  { %v635_v56 = vpop.permute.xlu0 %634 }
 0xd5c   :  { %v637_v57 = vmul.f32 %v1355_v48, %v635_v56  ;;  %v974_v56 = vld [vmem:[%s1594_s4 + $0x8] sm:$0xff] }
 0xd5e   :  { %v639_v58 = vrot.slane %v637_v57, 4  ;;  %v966_v59 = vsel %vm965_vm5, %v964_v38, %v637_v57  ;;  %v975_v57 = vld [vmem:[%s1594_s4 + $0x10] sm:$0xff] }
 0xd60   :  { %640 = vrot.lane.b32.xlu1 %v639_v58, %s1390_s3 }
 0xdd2   :  { %v641_v60 = vpop.permute.xlu1 %640 }
 0xdd3   :  { %1218 = vmatmul.mubr.msk.f32.vlgmr.msra.gmra.mrb[6].mxu0 %vm35_vm1, %v641_v60 }
 0xdd4   :  { %1303 = vmatpush3.bf16.msra.mxu0 %v1450_v9  ;;  %1239 = vmatprep.mubr.msk.f32.mxu0 %vm1387_vm0, %v1388_v8 }
 0xdd5   :  { %1304 = vmatprep.subr.bf16.mxu0 %v1386_v0 }
 0xdd8   :  { %1306 = vmatpush3.bf16.msra.mxu0 %v1460_v13  ;;  %v726_v13 = vrot.slane %v631_v54, 7 }
 0xea6   :  { %v710_v61 = vpop.f32.mrb[6].mxu0 }
 0xea7   :  { %v715_v62 = vrot.slane %v710_v61, 3  ;;  %v1219_v63 = vpop.f32.mrb[7].mxu0 }
 0xea9   :  { %v717_v1 = vadd.f32 %v715_v62, %v1486_v17 }
 0xeab   :  { %1358 = vtanh.f32 %v717_v1  ;;  %v1086_v3 = vmul.f32 -1.442695, %v717_v1 }
 0xead   :  { %1360 = vpow2.f32 %v1086_v3  ;;  %v1091_v3 = vld [vmem:[%s1595_s5] ss:$0 sm:$0xff] }
 0xeb5   :  { %v1359_v2 = vpop.eup %1358 }
 0xeb6   :  { %730 = vrot.lane.b32.xlu0 %v1359_v2, %s1389_s14 }
 0xeb7   :  { %v1361_v4 = vpop.eup %1360 }
 0xeb8   :  { %v721_v9 = vadd.f32 1.0, %v1361_v4 }
 0xeba   :  { %1362 = vrcp.f32 %v721_v9 }
 0xec4   :  { %v1363_v5 = vpop.eup %1362 }
 0xec5   :  { %v728_v10 = vmul.f32 %v1363_v5, %v726_v13 }
 0xf28   :  { %v731_v6 = vpop.permute.xlu0 %730 }
 0xf29   :  { %v733_v7 = vmul.f32 %v1363_v5, %v731_v6 }
 0xf2b   :  { %735 = vrot.lane.b32.xlu1 %v733_v7, %s1390_s3 }
 0xf9d   :  { %v736_v11 = vpop.permute.xlu1 %735 }
 0xf9e   :  { %v738_v12 = vadd.f32 %v736_v11, %v728_v10 }
 0xfa0   :  { %1364 = vtanh.f32 %v738_v12 }
 0xfaa   :  { %v1365_v14 = vpop.eup %1364 }
 0xfab   :  { %741 = vrot.lane.b32.xlu0 %v1365_v14, %s1389_s14 }
0x101d   :  { %v742_v15 = vpop.permute.xlu0 %741 }
0x101e   :  { %v744_v16 = vmul.f32 %v1363_v5, %v742_v15 }
0x1020   :  { %v746_v18 = vrot.slane %v744_v16, 5  ;;  %v968_v19 = vsel %vm967_vm6, %v966_v59, %v744_v16  ;;  %v976_v59 = vld [vmem:[%s1594_s4 + $0x18] sm:$0xff] }
0x1021   :  { %v1311_v60 = vpack.c.bf16 %v976_v59, %v975_v57 }
0x1022   :  { %747 = vrot.lane.b32.xlu1 %v746_v18, %s1390_s3 }
0x1094   :  { %v748_v20 = vpop.permute.xlu1 %747 }
0x1095   :  { %1229 = vmatmul.mubr.msk.f32.vlgmr.msra.gmra.mrb[6].mxu1 %vm35_vm1, %v748_v20 }
0x1096   :  { %1250 = vmatprep.mubr.msk.f32.mxu1 %vm1387_vm0, %v1388_v8  ;;  %v833_v8 = vrot.slane %v738_v12, 7 }
0x1168   :  { %v817_v21 = vpop.f32.mrb[6].mxu1 }
0x1169   :  { %v822_v22 = vrot.slane %v817_v21, 2  ;;  %v1230_v23 = vpop.f32.mrb[7].mxu1 }
0x116b   :  { %v824_v24 = vadd.f32 %v822_v22, %v1486_v17 }
0x116d   :  { %1366 = vtanh.f32 %v824_v24  ;;  %v1088_v26 = vmul.f32 -1.442695, %v824_v24 }
0x116f   :  { %1368 = vpow2.f32 %v1088_v26 }
0x1177   :  { %v1367_v25 = vpop.eup %1366 }
0x1178   :  { %837 = vrot.lane.b32.xlu0 %v1367_v25, %s1389_s14 }
0x1179   :  { %v1369_v27 = vpop.eup %1368 }
0x117a   :  { %v828_v28 = vadd.f32 1.0, %v1369_v27 }
0x117c   :  { %1370 = vrcp.f32 %v828_v28 }
0x1186   :  { %v1371_v29 = vpop.eup %1370 }
0x1187   :  { %v835_v32 = vmul.f32 %v1371_v29, %v833_v8 }
0x11ea   :  { %v838_v30 = vpop.permute.xlu0 %837 }
0x11eb   :  { %v840_v31 = vmul.f32 %v1371_v29, %v838_v30 }
0x11ed   :  { %842 = vrot.lane.b32.xlu1 %v840_v31, %s1390_s3 }
0x125f   :  { %v843_v33 = vpop.permute.xlu1 %842 }
0x1260   :  { %v845_v34 = vadd.f32 %v843_v33, %v835_v32 }
0x1262   :  { %1372 = vtanh.f32 %v845_v34  ;;  %v940_v52 = vrot.slane %v845_v34, 7 }
0x126c   :  { %v1373_v35 = vpop.eup %1372 }
0x126d   :  { %848 = vrot.lane.b32.xlu0 %v1373_v35, %s1389_s14 }
0x12df   :  { %v849_v36 = vpop.permute.xlu0 %848 }
0x12e0   :  { %v851_v37 = vmul.f32 %v1371_v29, %v849_v36 }
0x12e2   :  { %v853_v38 = vrot.slane %v851_v37, 6  ;;  %v970_v39 = vsel %vm969_vm7, %v968_v19, %v851_v37 }
0x12e4   :  { %854 = vrot.lane.b32.xlu1 %v853_v38, %s1390_s3 }
0x1356   :  { %v855_v40 = vpop.permute.xlu1 %854 }
0x1357   :  { %1240 = vmatmul.mubr.msk.f32.vlgmr.msra.gmra.mrb[8].mxu0 %vm35_vm1, %v855_v40 }
0x142a   :  { %v924_v41 = vpop.f32.mrb[8].mxu0 }
0x142b   :  { %v929_v42 = vrot.slane %v924_v41, 1  ;;  %v1241_v43 = vpop.f32.mrb[9].mxu0 }
0x142d   :  { %v931_v44 = vadd.f32 %v929_v42, %v1486_v17  ;;  %v973_v17 = vld [vmem:[%s1594_s4] sm:$0xff] }
0x142e   :  { %v1308_v58 = vpack.c.bf16 %v974_v56, %v973_v17 }
0x142f   :  { %1374 = vtanh.f32 %v931_v44  ;;  %v1090_v46 = vmul.f32 -1.442695, %v931_v44 }
0x1430   :  { %1309 = vmatpush3.bf16.msra.mxu1 %v1308_v58 }
0x1431   :  { %1376 = vpow2.f32 %v1090_v46  ;;  %1310 = vmatprep.subr.bf16.mxu1 %v1386_v0 }
0x1434   :  { %1312 = vmatpush3.bf16.msra.mxu1 %v1311_v60 }
0x1439   :  { %v1375_v45 = vpop.eup %1374 }
0x143a   :  { %944 = vrot.lane.b32.xlu0 %v1375_v45, %s1389_s14 }
0x143b   :  { %v1377_v47 = vpop.eup %1376 }
0x143c   :  { %v935_v48 = vadd.f32 1.0, %v1377_v47 }
0x143e   :  { %1378 = vrcp.f32 %v935_v48 }
0x1448   :  { %v1379_v49 = vpop.eup %1378 }
0x1449   :  { %v942_v53 = vmul.f32 %v1379_v49, %v940_v52 }
0x14ac   :  { %v945_v50 = vpop.permute.xlu0 %944 }
0x14ad   :  { %v947_v51 = vmul.f32 %v1379_v49, %v945_v50 }
0x14af   :  { %949 = vrot.lane.b32.xlu1 %v947_v51, %s1390_s3 }
0x1521   :  { %v950_v54 = vpop.permute.xlu1 %949 }
0x1522   :  { %v952_v55 = vadd.f32 %v950_v54, %v942_v53 }
0x1524   :  { %1380 = vtanh.f32 %v952_v55 }
0x152e   :  { %v1381_v61 = vpop.eup %1380 }
0x152f   :  { %955 = vrot.lane.b32.xlu0 %v1381_v61, %s1389_s14 }
0x15a1   :  { %v956_v62 = vpop.permute.xlu0 %955 }
0x15a2   :  { %v958_v63 = vmul.f32 %v1379_v49, %v956_v62 }
0x15a4   :  { %v972_v1 = vsel %vm971_vm8, %v970_v39, %v958_v63 }
0x15a5   :  { %985 = vrot.lane.b32.xlu1 %v972_v1, %s1390_s3 }
0x1617   :  { %v986_v2 = vpop.permute.xlu1 %985 }
0x1618   :  { %1251 = vmatmul.mubr.msk.f32.vlgmr.msra.gmra.mrb[8].mxu1 %vm35_vm1, %v986_v2 }
0x16eb   :  { %v1055_v4 = vpop.f32.mrb[8].mxu1 }
0x16ec   :  { %v1056_v9 = vadd.f32 %v1091_v3, %v1055_v4  ;;  %v1252_v0 = vpop.f32.mrb[9].mxu1 }
0x16ee   :  { %1059 = vmax.xlane.f32.xlu0 %v1056_v9 }
0x177b   :  { %v1060_v5 = vpop.xlane.xlu0 %1059 }
0x177c   :  { %v1061_v6 = vsub.f32 %v1056_v9, %v1060_v5 }
0x177e   :  { %v1062_v7 = vmul.f32 1.442695, %v1061_v6 }
0x1780   :  { %1382 = vpow2.f32 %v1062_v7 }
0x178a   :  { %v1383_v13 = vpop.eup %1382 }
0x178b   :  { %1064 = vadd.xlane.f32.xlu1 %v1383_v13 }
0x1818   :  { %v1065_v10 = vpop.xlane.xlu1 %1064 }
0x1819   :  { %1384 = vlog2.f32 %v1065_v10 }
0x1823   :  { %v1385_v11 = vpop.eup %1384 }
0x1824   :  { %v1067_v12 = vmul.f32 0.6931472, %v1385_v11 }
0x1826   :  { %v1068_v14 = vsub.f32 %v1061_v6, %v1067_v12 }
0x1828   :  { %1069 = vst [vmem:[%s1596_s6] sm:$0xff] %v1068_v14 }

</bundles_post_ra>
